<compile_context>
chip_gen: v6e
topology: v6e:2x2x1
jax: 0.10.0
libtpu: 0.0.40
codegen_flags: <defaults>
</compile_context>

<pallas_src>
import jax
import jax.numpy as jnp
from jax.experimental import pallas as pl
from jax.experimental.pallas import tpu as pltpu


def _make_kernel(num_layers, activation_mode, offset):
    """Fused (transposed) MLP + reduction kernel for `num_layers` Linear layers.

    `offset` must be a plain Python float (lowers to an immediate).
    """

    def kernel(*refs):
        # refs = [xT, w1, b1, ..., wL, bL, rT, o, acc]
        xT_ref = refs[0]
        rT_ref = refs[1 + 2 * num_layers]
        o_ref = refs[2 + 2 * num_layers]
        acc_ref = refs[3 + 2 * num_layers]

        @pl.when(pl.program_id(1) == 0)
        def _():
            acc_ref[...] = jnp.zeros_like(acc_ref)

        h = xT_ref[...]                      # (d_in, TILE_M), lane-dense
        for l in range(num_layers):
            w = refs[1 + 2 * l][...]         # (out_l, in_l)  (PyTorch layout)
            b = refs[2 + 2 * l][...]         # (out_l, 1)
            h = jnp.dot(w, h, preferred_element_type=jnp.float32) + b
            if l != num_layers - 1:
                h = jax.nn.sigmoid(h)
                if activation_mode != 0:
                    h = h - offset           # Python float -> immediate

        # o^T partial: (d_out, TILE_M) @ (TILE_M, n_struct)
        acc_ref[...] += jnp.dot(h, rT_ref[...],
                                preferred_element_type=jnp.float32)

        @pl.when(pl.program_id(1) == pl.num_programs(1) - 1)
        def _():
            o_ref[...] = acc_ref[...]

    return kernel


def torch_network_forward(x, weights, biases, reduction_matrix,
                          activation_mode=1, offset=0.5,
                          tile_m=512, n_split=2):
    """Pallas equivalent of TorchNetwork.forward.

    x:                (n_atoms, d_in)
    weights[i]:       (out_i, in_i)   (PyTorch nn.Linear layout, used as-is)
    biases[i]:        (out_i,)
    reduction_matrix: (n_struct, n_atoms)
    returns:          (n_struct, d_out)
    """
    n_atoms, d_in = x.shape
    n_struct = reduction_matrix.shape[0]
    num_layers = len(weights)
    d_out = weights[-1].shape[0]

    # Don't split across cores if there isn't at least one tile per split.
    n_split = max(1, min(n_split, pl.cdiv(n_atoms, tile_m)))

    # --- glue: transpose to atoms-on-lanes layout, pad the atom axis -------
    xT = jnp.asarray(x, jnp.float32).T                        # (d_in, n_atoms)
    rT = jnp.asarray(reduction_matrix, jnp.float32).T         # (n_atoms, n_struct)
    pad = (-n_atoms) % (tile_m * n_split)
    if pad:
        xT = jnp.pad(xT, ((0, 0), (0, pad)))
        rT = jnp.pad(rT, ((0, pad), (0, 0)))
    n_total = n_atoms + pad
    tiles_per_split = n_total // (tile_m * n_split)

    wts = [jnp.asarray(w, jnp.float32) for w in weights]            # (out, in)
    bss = [jnp.asarray(b, jnp.float32).reshape(-1, 1) for b in biases]  # (out, 1)

    grid = (n_split, tiles_per_split)

    in_specs = [
        pl.BlockSpec((d_in, tile_m),
                     lambda s, i: (0, s * tiles_per_split + i)),
    ]
    for w, b in zip(wts, bss):
        in_specs.append(pl.BlockSpec(w.shape, lambda s, i: (0, 0)))
        in_specs.append(pl.BlockSpec(b.shape, lambda s, i: (0, 0)))
    in_specs.append(
        pl.BlockSpec((tile_m, n_struct),
                     lambda s, i: (s * tiles_per_split + i, 0)))

    # One (d_out, n_struct) partial per split (per TensorCore on v7x).
    out_specs = pl.BlockSpec((None, d_out, n_struct), lambda s, i: (s, 0, 0))

    kernel = _make_kernel(num_layers, activation_mode, float(offset))

    args = [xT]
    for w, b in zip(wts, bss):
        args.extend([w, b])
    args.append(rT)

    partials = pl.pallas_call(
        kernel,
        out_shape=jax.ShapeDtypeStruct((n_split, d_out, n_struct), jnp.float32),
        grid_spec=pltpu.PrefetchScalarGridSpec(
            num_scalar_prefetch=0,
            grid=grid,
            in_specs=in_specs,
            out_specs=out_specs,
            scratch_shapes=[pltpu.VMEM((d_out, n_struct), jnp.float32)],
        ),
        compiler_params=pltpu.CompilerParams(
            # Atom tiles across cores (v7x); sequential accumulation inside.
            dimension_semantics=("parallel", "arbitrary"),
        ),
    )(*args)

    # Sum per-core partials and transpose the tiny result once.
    return partials.sum(axis=0).T                             # (n_struct, d_out)


def _reference_forward(x, weights, biases, reduction_matrix,
                       activation_mode=1, offset=0.5):
    h = x
    for l, (w, b) in enumerate(zip(weights, biases)):
        h = h @ w.T + b
        if l != len(weights) - 1:
            h = jax.nn.sigmoid(h)
            if activation_mode != 0:
                h = h - offset
    return reduction_matrix @ h


if __name__ == "__main__":
    # Small shapes consistent with the module: an MLP potential over atoms.
    layer_sizes = [16, 32, 32, 4]     # config.layer_sizes
    n_atoms = 2000                    # atomic environments (ragged -> padded)
    n_struct = 8                      # structures (rows of reduction_matrix)
    activation_mode = 1               # sigmoid(.) - 0.5 variant
    tile_m = 512
    n_split = 2

    key = jax.random.PRNGKey(0)
    keys = jax.random.split(key, 2 * (len(layer_sizes) - 1) + 1)

    # Deterministic parameter init (randomize_self uses uniform(-0.5, 0.5)).
    weights, biases = [], []
    for li in range(1, len(layer_sizes)):
        kw, kb = keys[2 * (li - 1)], keys[2 * (li - 1) + 1]
        weights.append(jax.random.uniform(
            kw, (layer_sizes[li], layer_sizes[li - 1]),
            minval=-0.5, maxval=0.5, dtype=jnp.float32))
        biases.append(jax.random.uniform(
            kb, (layer_sizes[li],), minval=-0.5, maxval=0.5, dtype=jnp.float32))

    x = jax.random.uniform(keys[-1], (n_atoms, layer_sizes[0]),
                           minval=-1.0, maxval=1.0, dtype=jnp.float32)

    # Deterministic reduction matrix: structure s sums its contiguous atoms.
    atoms_per_struct = n_atoms // n_struct
    struct_ids = jnp.minimum(jnp.arange(n_atoms) // atoms_per_struct,
                             n_struct - 1)
    reduction_matrix = (
        jnp.arange(n_struct)[:, None] == struct_ids[None, :]
    ).astype(jnp.float32)

    out = torch_network_forward(x, weights, biases, reduction_matrix,
                                activation_mode=activation_mode,
                                offset=0.5, tile_m=tile_m, n_split=n_split)
    out = jax.block_until_ready(out)

    ref = _reference_forward(x, weights, biases, reduction_matrix,
                             activation_mode=activation_mode, offset=0.5)
    assert out.shape == (n_struct, layer_sizes[-1])
    assert jnp.allclose(out, ref, atol=1e-4, rtol=1e-4)

    print("KERNEL_OK")
</pallas_src>

<mosaic_0001>
module attributes {stable_mosaic.version = 11 : i64} {
  func.func @kernel(%arg0: i32, %arg1: i32, %arg2: memref<16x512xf32, #tpu.memory_space<vmem>>, %arg3: memref<32x16xf32, #tpu.memory_space<vmem>>, %arg4: memref<32x1xf32, #tpu.memory_space<vmem>>, %arg5: memref<32x32xf32, #tpu.memory_space<vmem>>, %arg6: memref<32x1xf32, #tpu.memory_space<vmem>>, %arg7: memref<4x32xf32, #tpu.memory_space<vmem>>, %arg8: memref<4x1xf32, #tpu.memory_space<vmem>>, %arg9: memref<512x8xf32, #tpu.memory_space<vmem>>, %arg10: memref<1x4x8xf32, #tpu.memory_space<vmem>>, %arg11: memref<4x8xf32, #tpu.memory_space<vmem>>) attributes {dimension_semantics = [#tpu.dimension_semantics<parallel>, #tpu.dimension_semantics<arbitrary>], iteration_bounds = array<i64: 2, 2>, scalar_prefetch = 0 : i64, scratch_operands = 1 : i64, tpu.core_type = #tpu.core_type<tc>, window_params = [{transform_indices = @transform_0, window_bounds = array<i64: 16, 512>}, {pipeline_mode = #tpu.pipeline_mode<synchronous>, transform_indices = @transform_1, window_bounds = array<i64: 32, 16>}, {pipeline_mode = #tpu.pipeline_mode<synchronous>, transform_indices = @transform_2, window_bounds = array<i64: 32, 1>}, {pipeline_mode = #tpu.pipeline_mode<synchronous>, transform_indices = @transform_3, window_bounds = array<i64: 32, 32>}, {pipeline_mode = #tpu.pipeline_mode<synchronous>, transform_indices = @transform_4, window_bounds = array<i64: 32, 1>}, {pipeline_mode = #tpu.pipeline_mode<synchronous>, transform_indices = @transform_5, window_bounds = array<i64: 4, 32>}, {pipeline_mode = #tpu.pipeline_mode<synchronous>, transform_indices = @transform_6, window_bounds = array<i64: 4, 1>}, {transform_indices = @transform_7, window_bounds = array<i64: 512, 8>}, {transform_indices = @transform_8, window_bounds = array<i64: 1, 4, 8>}]} {
    %c0_i32 = arith.constant 0 : i32
    %0 = arith.cmpi eq, %arg1, %c0_i32 : i32
    %1 = arith.extui %0 : i1 to i32
    %c0_i32_0 = arith.constant 0 : i32
    %2 = arith.cmpi ne, %1, %c0_i32_0 : i32
    scf.if %2 {
      %cst_28 = arith.constant 0.000000e+00 : f32
      %41 = vector.broadcast %cst_28 : f32 to vector<4x8xf32>
      %c0_29 = arith.constant 0 : index
      %c0_30 = arith.constant 0 : index
      %42 = vector.load %arg11[%c0_29, %c0_30] : memref<4x8xf32, #tpu.memory_space<vmem>>, vector<4x8xf32>
      tpu.vector_store %arg11[%c0_29, %c0_30], %41 {strides = array<i32>} : memref<4x8xf32, #tpu.memory_space<vmem>>, vector<4x8xf32>,
    } else {
    }
    %c0 = arith.constant 0 : index
    %c0_1 = arith.constant 0 : index
    %3 = vector.load %arg2[%c0, %c0_1] : memref<16x512xf32, #tpu.memory_space<vmem>>, vector<16x512xf32>
    %c0_2 = arith.constant 0 : index
    %c0_3 = arith.constant 0 : index
    %4 = vector.load %arg3[%c0_2, %c0_3] : memref<32x16xf32, #tpu.memory_space<vmem>>, vector<32x16xf32>
    %c0_4 = arith.constant 0 : index
    %c0_5 = arith.constant 0 : index
    %5 = vector.load %arg4[%c0_4, %c0_5] : memref<32x1xf32, #tpu.memory_space<vmem>>, vector<32x1xf32>
    %cst = arith.constant dense<0.000000e+00> : vector<32x512xf32>
    %6 = tpu.matmul %4, %3, %cst {dimension_numbers = #tpu.dot_dimension_numbers<[1], [0], [0], [1], [0, 0, 1, 1], [], []>} : vector<32x16xf32>, vector<16x512xf32>, vector<32x512xf32> -> vector<32x512xf32>
    %7 = vector.broadcast %5 : vector<32x1xf32> to vector<32x512xf32>
    %8 = arith.addf %6, %7 : vector<32x512xf32>
    %9 = arith.negf %8 : vector<32x512xf32>
    %10 = math.exp %9 : vector<32x512xf32>
    %cst_6 = arith.constant 1.000000e+00 : f32
    %11 = vector.broadcast %cst_6 : f32 to vector<32x512xf32>
    %12 = arith.addf %11, %10 : vector<32x512xf32>
    %13 = arith.divf %11, %12 : vector<32x512xf32>
    %cst_7 = arith.constant 5.000000e-01 : f32
    %14 = vector.broadcast %cst_7 : f32 to vector<32x512xf32>
    %15 = arith.subf %13, %14 : vector<32x512xf32>
    %c0_8 = arith.constant 0 : index
    %c0_9 = arith.constant 0 : index
    %16 = vector.load %arg5[%c0_8, %c0_9] : memref<32x32xf32, #tpu.memory_space<vmem>>, vector<32x32xf32>
    %c0_10 = arith.constant 0 : index
    %c0_11 = arith.constant 0 : index
    %17 = vector.load %arg6[%c0_10, %c0_11] : memref<32x1xf32, #tpu.memory_space<vmem>>, vector<32x1xf32>
    %cst_12 = arith.constant dense<0.000000e+00> : vector<32x512xf32>
    %18 = tpu.matmul %16, %15, %cst_12 {dimension_numbers = #tpu.dot_dimension_numbers<[1], [0], [0], [1], [0, 0, 1, 1], [], []>} : vector<32x32xf32>, vector<32x512xf32>, vector<32x512xf32> -> vector<32x512xf32>
    %19 = vector.broadcast %17 : vector<32x1xf32> to vector<32x512xf32>
    %20 = arith.addf %18, %19 : vector<32x512xf32>
    %21 = arith.negf %20 : vector<32x512xf32>
    %22 = math.exp %21 : vector<32x512xf32>
    %cst_13 = arith.constant 1.000000e+00 : f32
    %23 = vector.broadcast %cst_13 : f32 to vector<32x512xf32>
    %24 = arith.addf %23, %22 : vector<32x512xf32>
    %25 = arith.divf %23, %24 : vector<32x512xf32>
    %cst_14 = arith.constant 5.000000e-01 : f32
    %26 = vector.broadcast %cst_14 : f32 to vector<32x512xf32>
    %27 = arith.subf %25, %26 : vector<32x512xf32>
    %c0_15 = arith.constant 0 : index
    %c0_16 = arith.constant 0 : index
    %28 = vector.load %arg7[%c0_15, %c0_16] : memref<4x32xf32, #tpu.memory_space<vmem>>, vector<4x32xf32>
    %c0_17 = arith.constant 0 : index
    %c0_18 = arith.constant 0 : index
    %29 = vector.load %arg8[%c0_17, %c0_18] : memref<4x1xf32, #tpu.memory_space<vmem>>, vector<4x1xf32>
    %cst_19 = arith.constant dense<0.000000e+00> : vector<4x512xf32>
    %30 = tpu.matmul %28, %27, %cst_19 {dimension_numbers = #tpu.dot_dimension_numbers<[1], [0], [0], [1], [0, 0, 1, 1], [], []>} : vector<4x32xf32>, vector<32x512xf32>, vector<4x512xf32> -> vector<4x512xf32>
    %31 = vector.broadcast %29 : vector<4x1xf32> to vector<4x512xf32>
    %32 = arith.addf %30, %31 : vector<4x512xf32>
    %c0_20 = arith.constant 0 : index
    %c0_21 = arith.constant 0 : index
    %33 = vector.load %arg11[%c0_20, %c0_21] : memref<4x8xf32, #tpu.memory_space<vmem>>, vector<4x8xf32>
    %c0_22 = arith.constant 0 : index
    %c0_23 = arith.constant 0 : index
    %34 = vector.load %arg9[%c0_22, %c0_23] : memref<512x8xf32, #tpu.memory_space<vmem>>, vector<512x8xf32>
    %cst_24 = arith.constant dense<0.000000e+00> : vector<4x8xf32>
    %35 = tpu.matmul %32, %34, %cst_24 {dimension_numbers = #tpu.dot_dimension_numbers<[1], [0], [0], [1], [0, 0, 1, 1], [], []>} : vector<4x512xf32>, vector<512x8xf32>, vector<4x8xf32> -> vector<4x8xf32>
    %36 = arith.addf %33, %35 : vector<4x8xf32>
    %c0_25 = arith.constant 0 : index
    %c0_26 = arith.constant 0 : index
    %37 = vector.load %arg11[%c0_25, %c0_26] : memref<4x8xf32, #tpu.memory_space<vmem>>, vector<4x8xf32>
    tpu.vector_store %arg11[%c0_25, %c0_26], %36 {strides = array<i32>} : memref<4x8xf32, #tpu.memory_space<vmem>>, vector<4x8xf32>,
    %c1_i32 = arith.constant 1 : i32
    %38 = arith.cmpi eq, %arg1, %c1_i32 : i32
    %39 = arith.extui %38 : i1 to i32
    %c0_i32_27 = arith.constant 0 : i32
    %40 = arith.cmpi ne, %39, %c0_i32_27 : i32
    scf.if %40 {
      %c0_28 = arith.constant 0 : index
      %c0_29 = arith.constant 0 : index
      %41 = vector.load %arg11[%c0_28, %c0_29] : memref<4x8xf32, #tpu.memory_space<vmem>>, vector<4x8xf32>
      %c0_30 = arith.constant 0 : index
      %c0_31 = arith.constant 0 : index
      %c0_32 = arith.constant 0 : index
      %42 = vector.load %arg10[%c0_30, %c0_31, %c0_32] : memref<1x4x8xf32, #tpu.memory_space<vmem>>, vector<1x4x8xf32>
      %43 = vector.shape_cast %42 : vector<1x4x8xf32> to vector<4x8xf32>
      %44 = vector.shape_cast %41 : vector<4x8xf32> to vector<1x4x8xf32>
      tpu.vector_store %arg10[%c0_30, %c0_31, %c0_32], %44 {strides = array<i32>} : memref<1x4x8xf32, #tpu.memory_space<vmem>>, vector<1x4x8xf32>,
    } else {
    }
    return
  }
  func.func @transform_0(%arg0: i32, %arg1: i32) -> (i32, i32) {
    %c2_i32 = arith.constant 2 : i32
    %0 = arith.muli %arg0, %c2_i32 : i32
    %1 = arith.addi %0, %arg1 : i32
    %c0_i32 = arith.constant 0 : i32
    %c0_i32_0 = arith.constant 0 : i32
    return %c0_i32, %1 : i32, i32
  }
  func.func @transform_1(%arg0: i32, %arg1: i32) -> (i32, i32) {
    %c0_i32 = arith.constant 0 : i32
    %c0_i32_0 = arith.constant 0 : i32
    %c0_i32_1 = arith.constant 0 : i32
    return %c0_i32, %c0_i32_0 : i32, i32
  }
  func.func @transform_2(%arg0: i32, %arg1: i32) -> (i32, i32) {
    %c0_i32 = arith.constant 0 : i32
    %c0_i32_0 = arith.constant 0 : i32
    %c0_i32_1 = arith.constant 0 : i32
    return %c0_i32, %c0_i32_0 : i32, i32
  }
  func.func @transform_3(%arg0: i32, %arg1: i32) -> (i32, i32) {
    %c0_i32 = arith.constant 0 : i32
    %c0_i32_0 = arith.constant 0 : i32
    %c0_i32_1 = arith.constant 0 : i32
    return %c0_i32, %c0_i32_0 : i32, i32
  }
  func.func @transform_4(%arg0: i32, %arg1: i32) -> (i32, i32) {
    %c0_i32 = arith.constant 0 : i32
    %c0_i32_0 = arith.constant 0 : i32
    %c0_i32_1 = arith.constant 0 : i32
    return %c0_i32, %c0_i32_0 : i32, i32
  }
  func.func @transform_5(%arg0: i32, %arg1: i32) -> (i32, i32) {
    %c0_i32 = arith.constant 0 : i32
    %c0_i32_0 = arith.constant 0 : i32
    %c0_i32_1 = arith.constant 0 : i32
    return %c0_i32, %c0_i32_0 : i32, i32
  }
  func.func @transform_6(%arg0: i32, %arg1: i32) -> (i32, i32) {
    %c0_i32 = arith.constant 0 : i32
    %c0_i32_0 = arith.constant 0 : i32
    %c0_i32_1 = arith.constant 0 : i32
    return %c0_i32, %c0_i32_0 : i32, i32
  }
  func.func @transform_7(%arg0: i32, %arg1: i32) -> (i32, i32) {
    %c2_i32 = arith.constant 2 : i32
    %0 = arith.muli %arg0, %c2_i32 : i32
    %1 = arith.addi %0, %arg1 : i32
    %c0_i32 = arith.constant 0 : i32
    %c0_i32_0 = arith.constant 0 : i32
    return %1, %c0_i32 : i32, i32
  }
  func.func @transform_8(%arg0: i32, %arg1: i32) -> (i32, i32, i32) {
    %c0_i32 = arith.constant 0 : i32
    %c0_i32_0 = arith.constant 0 : i32
    %c0_i32_1 = arith.constant 0 : i32
    return %arg0, %c0_i32, %c0_i32_0 : i32, i32, i32
  }
}

</mosaic_0001>

<bundles_post_ra>
// kernel: tpu_custom_call.1
= control target key start
LH: loop header
LB: loop body
LE: loop exit
PB: predicated region body
PF: predicated region fallthrough
CT: control target
= control target key end

     0   :  { %s2428_s0 = inlined_call_operand.vmem [shape: f32[16,2048], index: 0, kind: input, shape index: {}]   ;;  %s2429_s1 = inlined_call_operand.vmem [shape: f32[32,16], index: 1, kind: input, shape index: {}]   ;;  %s2430_s2 = inlined_call_operand.vmem [shape: f32[32,1], index: 2, kind: input, shape index: {}]   ;;  %s2431_s3 = inlined_call_operand.vmem [shape: f32[32,32], index: 3, kind: input, shape index: {}]   ;;  %s2432_s4 = inlined_call_operand.vmem [shape: f32[32,1], index: 4, kind: input, shape index: {}]   ;;  %s2433_s5 = inlined_call_operand.vmem [shape: f32[4,32], index: 5, kind: input, shape index: {}]   ;;  %s2434_s6 = inlined_call_operand.vmem [shape: f32[4,1], index: 6, kind: input, shape index: {}]   ;;  %s2435_s7 = inlined_call_operand.vmem [shape: f32[2048,8], index: 7, kind: input, shape index: {}]   ;;  %s2436_s8 = inlined_call_operand.hbm [shape: f32[2,4,8], index: 8, kind: output, shape index: {}]  }
   0x1   :  { %2442 = sst [smem:[#allocation10_spill]] %s2428_s0 }
   0x2   :  { %2443 = sst [smem:[#allocation11_spill]] %s2431_s3 }
   0x3   :  { %2444 = sst [smem:[#allocation12_spill]] %s2433_s5 }
   0x4   :  { %2445 = sst [smem:[#allocation13_spill]] %s2436_s8 }
   0x5   :  { %13 = vsyncpa [#allocation5], 0 }
   0x6   :  { %15 = vsyncpa [#allocation5 + $0x1], 0  ;;  %s2097_s27 = smov 0   ;;  %s2099_s28 = smov 0  }
   0x7   :  { %s2101_s29 = smov 0   ;;  %s2103_s30 = smov 0  }
   0x8   :  { %s2105_s9 = smov 0   ;;  %s2107_s10 = smov 0  }
   0x9   :  { %s2109_s11 = smov 0   ;;  %s2111_s12 = smov 0  }
   0xa   :  { %s2113_s13 = smov 0   ;;  %s2115_s14 = smov 0  }
   0xb LB: > { %2446 = sst [smem:[#allocation7_spill]] %s2038_s12  ;;  %s1541_s15 = sadd.s32 4294967295, %s2046_s14   ;;  %s2046_s14 = sphi %s2115_s14, %s21_s14   ;;  %s2042_s13 = sphi %s2113_s13, %s2465_s13   ;;  %s2038_s12 = sphi %s2111_s12, %s2457_s12   ;;  %s2034_s11 = sphi %s2109_s11, %s2464_s11   ;;  %s2030_s10 = sphi %s2107_s10, %s2456_s10   ;;  %s2026_s9 = sphi %s2105_s9, %s2463_s9   ;;  %s2022_s30 = sphi %s2103_s30, %s2462_s30   ;;  %s2018_s29 = sphi %s2101_s29, %s2461_s29   ;;  %s2014_s28 = sphi %s2099_s28, %s2460_s28   ;;  %s2010_s27 = sphi %s2097_s27, %s2459_s27  }
   0xc   : > { %s1542_s16 = sadd.s32 4294967294, %s2046_s14   ;;  %s30_s17 = sadd.s32 1, %s2038_s12 }
   0xd   : > { %s33_s18 = sadd.s32 1, %s2042_s13  ;;  %p31_p0 = scmp.ge.s32.totalorder %s30_s17, 2 }
   0xe   : > { %s1543_s19 = sshll.u32 %s2042_s13, 1  ;;  %s44_s21 = sadd.s32 1, %s2026_s9 }
   0xf   : > { %s2153_s20 = sadd.s32 %s2038_s12, %s1543_s19  ;;  %s2467_s17 = smov (%p31_p0, %s30_s17), 0 }
  0x10   : > { %2447 = sst [smem:[#allocation8_spill]] %s2467_s17  ;;  %s2469_s18 = smov (!%p31_p0, %s33_s18), %s2042_s13 }
  0x11   : > { %p51_p1 = scmp.ne.s32.totalorder %s2026_s9, %s2022_s30  ;;  %p52_p2 = scmp.eq.s32.totalorder %s2046_s14, 0 }
  0x12   : > { %p35_p3 = scmp.ge.s32.totalorder %s2469_s18, 2  ;;  %s226_s22 = sadd.s32 1, %s2018_s29 }
  0x13   : > { %p2163_p4 = por %p52_p2, %p51_p1  ;;  %p236_p5 = scmp.ne.s32.totalorder %s2018_s29, %s2014_s28 }
  0x14   : > { %s2471_s18 = smov (%p35_p3, %s2469_s18), 0  ;;  %p237_p6 = scmp.eq.s32.totalorder %s1541_s15, 3 }
  0x15   : > { %2449 = sst [smem:[#allocation9_spill]] %s2471_s18  ;;  %p242_p7 = scmp.ne.s32.totalorder %s2014_s28, %s2010_s27 }
  0x16   : > { %s1544_s24 = sshll.u32 %s2471_s18, 1  ;;  %s223_s25 = ssub.s32 %s2042_s13, %s2471_s18 }
  0x17   : > { %s40_s26 = sadd.s32 %s1544_s24, %s2467_s17  ;;  %p224_p8 = scmp.eq.s32.totalorder %s223_s25, 0 }
  0x18   : > { %s41_s19 = ssub.s32 %s2153_s20, %s40_s26  ;;  %p2178_p9 = por %p237_p6, %p236_p5 }
  0x19   : > { %p42_p10 = scmp.eq.s32.totalorder %s41_s19, 0  ;;  %p243_p11 = scmp.eq.s32.totalorder %s1542_s16, 3 }
  0x1a   : > { %s2183_s8 = scalar_select %p224_p8, %s2018_s29, %s226_s22  }
  0x1b   : > { %s2186_s5 = scalar_select %p42_p10, %s2026_s9, %s44_s21  }
  0x1c   : > { %p2188_p12 = por %p243_p11, %p242_p7  ;;  %p1548_p13 = scmp.ge.s32.totalorder %s2046_s14, 4 }
  0x1e   : > { %277 = sbr.rel (%p1548_p13) target bundleno = 49 (0x31), region = 40 }
  0x23   : > { %280 = sbr.rel (!%p2163_p4) target bundleno = 49 (0x31), region = 44  ;;  %s282_s15 = sand.u32 (%p2163_p4), 1, %s2026_s9  }
  0x24   : > { %s1647_s24 = sshll.u32 (%p2163_p4), %s2153_s20, 5  ;;  %s1549_s25 = sshll.u32 (%p2163_p4), %s282_s15, 6 }
  0x25   : > { %s2452_s0 = sld [smem:[#allocation10_spill]] (%p2163_p4)  ;;  %s284_s26 = scalar_lea.vmem (%p2163_p4), [#allocation3], %s1549_s25 }
  0x2b   : > { %s289_s21 = scalar_lea.vmem %s2452_s0, %s1647_s24 }
  0x2c   : > { %v302_v0 = vld [vmem:[%s289_s21] sm:$0xff]  ;;  %v304_v1 = vld [vmem:[%s289_s21 + $0x8] sm:$0xff]  ;;  %v306_v2 = vld [vmem:[%s289_s21 + $0x10] sm:$0xff] }
  0x2d   : > { %303 = vst [vmem:[%s284_s26] sm:$0xff] %v302_v0  ;;  %305 = vst [vmem:[%s284_s26 + $0x8] sm:$0xff] %v304_v1  ;;  %v308_v3 = vld [vmem:[%s289_s21 + $0x18] sm:$0xff]  ;;  %v310_v4 = vld [vmem:[%s289_s21 + $0x80] sm:$0xff] }
  0x2e   : > { %307 = vst [vmem:[%s284_s26 + $0x10] sm:$0xff] %v306_v2  ;;  %v312_v5 = vld [vmem:[%s289_s21 + $0x88] sm:$0xff]  ;;  %309 = vst [vmem:[%s284_s26 + $0x18] sm:$0xff] %v308_v3  ;;  %v314_v6 = vld [vmem:[%s289_s21 + $0x90] sm:$0xff] }
  0x2f   : > { %311 = vst [vmem:[%s284_s26 + $0x20] sm:$0xff] %v310_v4  ;;  %313 = vst [vmem:[%s284_s26 + $0x28] sm:$0xff] %v312_v5  ;;  %v316_v7 = vld [vmem:[%s289_s21 + $0x98] sm:$0xff] }
  0x30   : > { %315 = vst [vmem:[%s284_s26 + $0x30] sm:$0xff] %v314_v6  ;;  %317 = vst [vmem:[%s284_s26 + $0x38] sm:$0xff] %v316_v7 }
  0x31 PF: > { %p1553_p0 = scmp.ge.s32.totalorder %s2046_s14, 1  ;;  %p335_p1 = scmp.lt.s32.totalorder %s2046_s14, 5 }
  0x33   : > { %p336_p2 = pnand %p1553_p0, %p335_p1 }
  0x34   : > { %s342_s20 = sand.u32 (!%p336_p2), 1, %s2022_s30   ;;  %s379_s23 = sand.u32 (!%p336_p2), 1, %s2014_s28  }
  0x35   : > { %339 = sbr.rel (%p336_p2) target bundleno = 1006 (0x3ee), region = 71  ;;  %s1554_s19 = sshll.u32 (!%p336_p2), %s342_s20, 6 }
  0x36   : > { %s2206_s15 = sshll.u32 (!%p336_p2), %s379_s23, 2  ;;  %s1556_s24 = sshll.u32 (!%p336_p2), %s2034_s11, 1 }
  0x37   : > { %s386_s25 = sadd.s32 (!%p336_p2), %s2030_s10, %s1556_s24  ;;  %s344_s18 = scalar_lea.vmem (!%p336_p2), [#allocation3], %s1554_s19 }
  0x38   : > { %s1557_s16 = sshll.u32 (!%p336_p2), %s386_s25, 6  ;;  %s381_s17 = scalar_lea.vmem (!%p336_p2), [#allocation4], %s2206_s15 }
  0x39   : > { %p388_p3 = scmp.lt.s32.totalorder (!%p336_p2), %s1557_s16, 255  ;;  %p1559_p4 = scmp.ne.s32.totalorder (!%p336_p2), %s2030_s10, 0 }
  0x3b   : > { %s2473_s16 = smov (!%p388_p3, %s1557_s16), 255  ;;  %398 = sbr.rel (%p1559_p4) target bundleno = 66 (0x42), region = 79 }
  0x3c   : > { %s1558_s22 = sshll.u32 %s2473_s16, 3 }
  0x3d   : > { %s2213_s0 = scalar_lea.vmem %s2435_s7, %s1558_s22 }
  0x40   : > { %vm399_vm0 = vcmask 60416   ;;  %v2048_v8 = vmov 0.0  }
  0x41   : > { %400 = vst.msk [vmem:[#allocation2] sm:$0xf] %vm399_vm0, %v2048_v8 }
  0x42 PF: > { %v406_v9 = vld [vmem:[%s344_s18 + $0x28] sm:$0xff]  ;;  %v408_v10 = vld [vmem:[%s344_s18 + $0x38] sm:$0xff]  ;;  %v405_v11 = vld [vmem:[%s344_s18 + $0x20] sm:$0xff]  ;;  %vm437_vm1 = vcmask 130048   ;;  %v2049_v18 = vmov 0.0   ;;  %v2050_v22 = vmov 0  }
  0x43   : > { %478 = vmatprep.subr.mxu0 %v406_v9  ;;  %567 = vmatprep.subr.mxu1 %v408_v10  ;;  %v407_v12 = vld [vmem:[%s344_s18 + $0x30] sm:$0xff]  ;;  %v402_v13 = vld [vmem:[%s344_s18 + $0x8] sm:$0xff]  ;;  %v404_v14 = vld [vmem:[%s344_s18 + $0x18] sm:$0xff]  ;;  %s2453_s21 = sld [smem:[#allocation11_spill]]  ;;  %vm768_vm2 = vcmask 261120   ;;  %vm1429_vm3 = vcmask 60416  }
  0x44   : > { %479 = vmatpush1.msra.mxu0 %v405_v11  ;;  %568 = vmatpush1.msra.mxu1 %v407_v12  ;;  %v401_v15 = vld [vmem:[%s344_s18] sm:$0xff]  ;;  %v403_v16 = vld [vmem:[%s344_s18 + $0x10] sm:$0xff]  ;;  %v1072_v31 = vld [vmem:[%s2434_s6] sm:$0xf]  ;;  %s2454_s22 = sld [smem:[#allocation12_spill]]  ;;  %p1642_p5 = scmp.ne.s32.totalorder %s2030_s10, 1 }
  0x45   : > { %480 = vmatprep.subr.mxu0 %v402_v13  ;;  %569 = vmatprep.subr.mxu1 %v404_v14  ;;  %v409_v17 = vld [vmem:[%s2429_s1] sm:$0xff]  ;;  %v416_v19 = vld [vmem:[%s2430_s2 + $0x18] sm:$0xff]  ;;  %v414_v20 = vld [vmem:[%s2430_s2 + $0x8] sm:$0xff] }
  0x46   : > { %481 = vmatpush1.msra.mxu0 %v401_v15  ;;  %514 = vmatprep.mubr.f32.mxu0 %v2049_v18  ;;  %v410_v21 = vld [vmem:[%s2429_s1 + $0x8] sm:$0xff]  ;;  %v415_v23 = vld [vmem:[%s2430_s2 + $0x10] sm:$0xff]  ;;  %v413_v24 = vld [vmem:[%s2430_s2] sm:$0xff] }
  0x47   : > { %570 = vmatpush1.msra.mxu1 %v403_v16  ;;  %603 = vmatprep.mubr.f32.mxu1 %v2049_v18  ;;  %v411_v25 = vld [vmem:[%s2429_s1 + $0x10] sm:$0xff]  ;;  %v747_v26 = vld [vmem:[%s2432_s4 + $0x18] sm:$0xff]  ;;  %v745_v29 = vld [vmem:[%s2432_s4 + $0x8] sm:$0xff] }
  0x48   : > { %1560 = vmatmul.mubr.msk.f32.vlgmr.msra.gmra.mxu0 %vm437_vm1, %v409_v17  ;;  %1564 = vmatmul.mubr.msk.f32.vlgmr.msra.gmra.mxu1 %vm437_vm1, %v409_v17  ;;  %v746_v27 = vld [vmem:[%s2432_s4 + $0x10] sm:$0xff]  ;;  %v412_v28 = vld [vmem:[%s2429_s1 + $0x18] sm:$0xff]  ;;  %v744_v30 = vld [vmem:[%s2432_s4] sm:$0xff] }
  0x49   : > { %520 = vmatprep.mubr.f32.mxu0 %v2049_v18  ;;  %609 = vmatprep.mubr.f32.mxu1 %v2049_v18 }
  0x4a   : > { %1809 = vset.pattern.permute.xlu1 %v2050_v22  ;;  %1808 = vset.pattern.permute.xlu0 %v2050_v22 }
  0x4b   : > { %434 = vperm.xlu0 %1808, %v416_v19   ;;  %424 = vperm.xlu1 %1809, %v414_v20  }
  0x4c   : > { %1561 = vmatmul.mubr.msk.f32.gmra.mxu0 %vm437_vm1, %v410_v21  ;;  %1565 = vmatmul.mubr.msk.f32.gmra.mxu1 %vm437_vm1, %v410_v21 }
  0x4d   : > { %526 = vmatprep.mubr.f32.mxu0 %v2049_v18  ;;  %615 = vmatprep.mubr.f32.mxu1 %v2049_v18 }
  0x4f   : > { %429 = vperm.xlu0 %1808, %v415_v23   ;;  %419 = vperm.xlu1 %1809, %v413_v24  }
  0x50   : > { %1562 = vmatmul.mubr.msk.f32.gmra.mxu0 %vm437_vm1, %v411_v25  ;;  %1566 = vmatmul.mubr.msk.f32.gmra.mxu1 %vm437_vm1, %v411_v25 }
  0x51   : > { %532 = vmatprep.mubr.f32.mxu0 %v2049_v18  ;;  %621 = vmatprep.mubr.f32.mxu1 %v2049_v18 }
  0x53   : > { %765 = vperm.xlu0 %1808, %v747_v26   ;;  %760 = vperm.xlu1 %1809, %v746_v27  }
  0x54   : > { %1563 = vmatmul.mubr.msk.f32.gmra.mxu0 %vm437_vm1, %v412_v28  ;;  %1567 = vmatmul.mubr.msk.f32.gmra.mxu1 %vm437_vm1, %v412_v28 }
  0x55   : > { %845 = vmatprep.mubr.f32.mxu0 %v2049_v18  ;;  %934 = vmatprep.mubr.f32.mxu1 %v2049_v18 }
  0x57   : > { %755 = vperm.xlu0 %1808, %v745_v29   ;;  %750 = vperm.xlu1 %1809, %v744_v30  }
  0x5b   : > { %1075 = vperm.xlu0 %1808, %v1072_v31  }
  0xc6   : > { %v425_v32 = vpop.permute.xlu1 %424  ;;  %v435_v36 = vpop.permute.xlu0 %434 }
  0xca   : > { %v420_v33 = vpop.permute.xlu1 %419  ;;  %v430_v51 = vpop.permute.xlu0 %429 }
 0x108   : > { %v516_v34 = vpop.f32.mrf.mxu0  ;;  %v605_v35 = vpop.f32.mrf.mxu1 }
 0x109   : > { %v517_v37 = vadd.f32 %v516_v34, %v420_v33  ;;  %v606_v3 = vadd.f32 %v605_v35, %v420_v33 }
 0x10a   : > { %v518_v38 = vpop.f32.mrf.mxu0  ;;  %v607_v39 = vpop.f32.mrf.mxu1 }
 0x10b   : > { %v1568_v40 = vmul.f32 -1.442695, %v517_v37  ;;  %v519_v41 = vadd.f32 %v518_v38, %v420_v33  ;;  %v608_v42 = vadd.f32 %v607_v39, %v420_v33  ;;  %v1570_v17 = vmul.f32 -1.442695, %v606_v3 }
 0x10c   : > { %v522_v43 = vpop.f32.mrf.mxu0  ;;  %v611_v44 = vpop.f32.mrf.mxu1 }
 0x10d   : > { %v1569_v45 = vmul.f32 -1.442695, %v519_v41  ;;  %v1571_v46 = vmul.f32 -1.442695, %v608_v42  ;;  %v523_v47 = vadd.f32 %v522_v43, %v425_v32  ;;  %1810 = vpow2.f32 %v1568_v40 }
 0x10e   : > { %v612_v48 = vadd.f32 %v611_v44, %v425_v32  ;;  %v524_v49 = vpop.f32.mrf.mxu0  ;;  %v613_v50 = vpop.f32.mrf.mxu1 }
 0x10f   : > { %1812 = vpow2.f32 %v1569_v45  ;;  %v1572_v52 = vmul.f32 -1.442695, %v523_v47  ;;  %v525_v53 = vadd.f32 %v524_v49, %v425_v32  ;;  %v614_v54 = vadd.f32 %v613_v50, %v425_v32 }
 0x110   : > { %1814 = vpow2.f32 %v1571_v46  ;;  %v1574_v55 = vmul.f32 -1.442695, %v612_v48  ;;  %v528_v56 = vpop.f32.mrf.mxu0  ;;  %v617_v57 = vpop.f32.mrf.mxu1 }
 0x111   : > { %1816 = vpow2.f32 %v1572_v52  ;;  %v1573_v58 = vmul.f32 -1.442695, %v525_v53  ;;  %v1575_v59 = vmul.f32 -1.442695, %v614_v54  ;;  %v529_v60 = vadd.f32 %v528_v56, %v430_v51 }
 0x112   : > { %1818 = vpow2.f32 %v1574_v55  ;;  %v618_v61 = vadd.f32 %v617_v57, %v430_v51  ;;  %v530_v62 = vpop.f32.mrf.mxu0  ;;  %v619_v63 = vpop.f32.mrf.mxu1 }
 0x113   : > { %1820 = vpow2.f32 %v1573_v58  ;;  %v1576_v0 = vmul.f32 -1.442695, %v529_v60  ;;  %v531_v1 = vadd.f32 %v530_v62, %v430_v51  ;;  %v620_v2 = vadd.f32 %v619_v63, %v430_v51 }
 0x114   : > { %1822 = vpow2.f32 %v1575_v59  ;;  %v1578_v4 = vmul.f32 -1.442695, %v618_v61  ;;  %v534_v5 = vpop.f32.mrf.mxu0  ;;  %v623_v6 = vpop.f32.mrf.mxu1 }
 0x115   : > { %1824 = vpow2.f32 %v1576_v0  ;;  %v1577_v7 = vmul.f32 -1.442695, %v531_v1  ;;  %v1579_v8 = vmul.f32 -1.442695, %v620_v2  ;;  %v535_v9 = vadd.f32 %v534_v5, %v435_v36 }
 0x116   : > { %1826 = vpow2.f32 %v1578_v4  ;;  %v624_v10 = vadd.f32 %v623_v6, %v435_v36  ;;  %v536_v11 = vpop.f32.mrf.mxu0  ;;  %v625_v12 = vpop.f32.mrf.mxu1 }
 0x117   : > { %1828 = vpow2.f32 %v1577_v7  ;;  %v1580_v13 = vmul.f32 -1.442695, %v535_v9  ;;  %v537_v14 = vadd.f32 %v536_v11, %v435_v36  ;;  %v626_v15 = vadd.f32 %v625_v12, %v435_v36 }
 0x118   : > { %1830 = vpow2.f32 %v1579_v8  ;;  %v1582_v16 = vmul.f32 -1.442695, %v624_v10 }
 0x119   : > { %1832 = vpow2.f32 %v1580_v13  ;;  %v1581_v19 = vmul.f32 -1.442695, %v537_v14  ;;  %v1583_v20 = vmul.f32 -1.442695, %v626_v15 }
 0x11a   : > { %1834 = vpow2.f32 %v1582_v16  ;;  %v1811_v21 = vpop.eup %1810 }
 0x11b   : > { %1836 = vpow2.f32 %v1581_v19  ;;  %v676_v25 = vadd.f32 1.0, %v1811_v21  ;;  %v740_v21 = vld [vmem:[%s2453_s21] sm:$0xff] }
 0x11c   : > { %v1813_v22 = vpop.eup %1812  ;;  %1838 = vpow2.f32 %v1583_v20 }
 0x11d   : > { %v1815_v23 = vpop.eup %1814  ;;  %1840 = vpow2.f32 %v1570_v17  ;;  %v677_v27 = vadd.f32 1.0, %v1813_v22 }
 0x11e   : > { %v1817_v24 = vpop.eup %1816  ;;  %1842 = vrcp.f32 %v676_v25  ;;  %v679_v51 = vadd.f32 1.0, %v1815_v23  ;;  %v741_v23 = vld [vmem:[%s2453_s21 + $0x8] sm:$0xff]  ;;  %v743_v25 = vld [vmem:[%s2453_s21 + $0x18] sm:$0xff] }
 0x11f   : > { %v1819_v26 = vpop.eup %1818  ;;  %v680_v29 = vadd.f32 1.0, %v1817_v24  ;;  %1844 = vrcp.f32 %v677_v27  ;;  %v742_v24 = vld [vmem:[%s2453_s21 + $0x10] sm:$0xff]  ;;  %v766_v27 = vpop.permute.xlu0 %765 }
 0x120   : > { %v1821_v28 = vpop.eup %1820  ;;  %v682_v50 = vadd.f32 1.0, %v1819_v26  ;;  %v761_v26 = vpop.permute.xlu1 %760 }
 0x121   : > { %v1823_v30 = vpop.eup %1822  ;;  %v681_v31 = vadd.f32 1.0, %v1821_v28  ;;  %1846 = vrcp.f32 %v680_v29 }
 0x122   : > { %v1825_v32 = vpop.eup %1824  ;;  %v683_v48 = vadd.f32 1.0, %v1823_v30 }
 0x123   : > { %v1827_v33 = vpop.eup %1826  ;;  %v684_v34 = vadd.f32 1.0, %v1825_v32  ;;  %1848 = vrcp.f32 %v681_v31 }
 0x124   : > { %v1829_v35 = vpop.eup %1828  ;;  %v686_v45 = vadd.f32 1.0, %v1827_v33  ;;  %v751_v28 = vpop.permute.xlu1 %750 }
 0x125   : > { %v1831_v36 = vpop.eup %1830  ;;  %v685_v37 = vadd.f32 1.0, %v1829_v35  ;;  %1850 = vrcp.f32 %v684_v34 }
 0x126   : > { %v1833_v38 = vpop.eup %1832  ;;  %v687_v39 = vadd.f32 1.0, %v1831_v36  ;;  %v756_v36 = vpop.permute.xlu0 %755 }
 0x127   : > { %v1835_v40 = vpop.eup %1834  ;;  %1852 = vrcp.f32 %v685_v37  ;;  %v688_v41 = vadd.f32 1.0, %v1833_v38 }
 0x128   : > { %v1837_v42 = vpop.eup %1836  ;;  %1854 = vrcp.f32 %v687_v39  ;;  %v690_v43 = vadd.f32 1.0, %v1835_v40 }
 0x129   : > { %v1839_v44 = vpop.eup %1838  ;;  %1856 = vrcp.f32 %v688_v41  ;;  %v689_v46 = vadd.f32 1.0, %v1837_v42 }
 0x12a   : > { %v1841_v47 = vpop.eup %1840  ;;  %1858 = vrcp.f32 %v690_v43  ;;  %v691_v49 = vadd.f32 1.0, %v1839_v44 }
 0x12b   : > { %1860 = vrcp.f32 %v689_v46  ;;  %v678_v52 = vadd.f32 1.0, %v1841_v47  ;;  %v1843_v53 = vpop.eup %1842 }
 0x12c   : > { %1862 = vrcp.f32 %v691_v49  ;;  %v1845_v54 = vpop.eup %1844  ;;  %v1584_v20 = vadd.f32 -0.5, %v1843_v53 }
 0x12d   : > { %1864 = vrcp.f32 %v686_v45  ;;  %v1585_v17 = vadd.f32 -0.5, %v1845_v54 }
 0x12e   : > { %1866 = vrcp.f32 %v683_v48  ;;  %v1847_v55 = vpop.eup %1846 }
 0x12f   : > { %1868 = vrcp.f32 %v682_v50  ;;  %v1588_v15 = vadd.f32 -0.5, %v1847_v55 }
 0x130   : > { %1870 = vrcp.f32 %v679_v51  ;;  %v1849_v56 = vpop.eup %1848 }
 0x131   : > { %1872 = vrcp.f32 %v678_v52  ;;  %v1589_v12 = vadd.f32 -0.5, %v1849_v56 }
 0x132   : > { %v1851_v57 = vpop.eup %1850 }
 0x133   : > { %v1592_v9 = vadd.f32 -0.5, %v1851_v57 }
 0x134   : > { %v1853_v58 = vpop.eup %1852 }
 0x135   : > { %v1855_v59 = vpop.eup %1854  ;;  %v1593_v6 = vadd.f32 -0.5, %v1853_v58 }
 0x136   : > { %v1857_v60 = vpop.eup %1856  ;;  %v1595_v8 = vadd.f32 -0.5, %v1855_v59 }
 0x137   : > { %v1859_v61 = vpop.eup %1858  ;;  %v1596_v3 = vadd.f32 -0.5, %v1857_v60 }
 0x138   : > { %v1861_v62 = vpop.eup %1860  ;;  %v1598_v5 = vadd.f32 -0.5, %v1859_v61 }
 0x139   : > { %v1863_v63 = vpop.eup %1862  ;;  %v1597_v0 = vadd.f32 -0.5, %v1861_v62 }
 0x13a   : > { %v1865_v1 = vpop.eup %1864  ;;  %v1599_v2 = vadd.f32 -0.5, %v1863_v63 }
 0x13b   : > { %v1867_v4 = vpop.eup %1866  ;;  %805 = vmatprep.subr.mxu0 %v1597_v0  ;;  %v1594_v11 = vadd.f32 -0.5, %v1865_v1 }
 0x13c   : > { %v1869_v7 = vpop.eup %1868  ;;  %894 = vmatprep.subr.mxu1 %v1599_v2  ;;  %806 = vmatpush1.msra.mxu0 %v1596_v3  ;;  %v1591_v14 = vadd.f32 -0.5, %v1867_v4 }
 0x13d   : > { %v1871_v10 = vpop.eup %1870  ;;  %895 = vmatpush1.msra.mxu1 %v1598_v5  ;;  %807 = vmatprep.subr.mxu0 %v1593_v6  ;;  %v1590_v16 = vadd.f32 -0.5, %v1869_v7 }
 0x13e   : > { %v1873_v13 = vpop.eup %1872  ;;  %896 = vmatprep.subr.mxu1 %v1595_v8  ;;  %808 = vmatpush1.msra.mxu0 %v1592_v9  ;;  %v1587_v19 = vadd.f32 -0.5, %v1871_v10 }
 0x13f   : > { %897 = vmatpush1.msra.mxu1 %v1594_v11  ;;  %809 = vmatprep.subr.mxu0 %v1589_v12  ;;  %v1586_v22 = vadd.f32 -0.5, %v1873_v13 }
 0x140   : > { %898 = vmatprep.subr.mxu1 %v1591_v14  ;;  %810 = vmatpush1.msra.mxu0 %v1588_v15 }
 0x141   : > { %899 = vmatpush1.msra.mxu1 %v1590_v16  ;;  %811 = vmatprep.subr.mxu0 %v1585_v17 }
 0x142   : > { %900 = vmatprep.subr.mxu1 %v1587_v19  ;;  %812 = vmatpush1.msra.mxu0 %v1584_v20 }
 0x143   : > { %901 = vmatpush1.msra.mxu1 %v1586_v22  ;;  %1600 = vmatmul.mubr.msk.f32.vlgmr.msra.gmra.mxu0 %vm768_vm2, %v740_v21 }
 0x144   : > { %1604 = vmatmul.mubr.msk.f32.vlgmr.msra.gmra.mxu1 %vm768_vm2, %v740_v21  ;;  %851 = vmatprep.mubr.f32.mxu0 %v2049_v18 }
 0x145   : > { %940 = vmatprep.mubr.f32.mxu1 %v2049_v18 }
 0x147   : > { %1601 = vmatmul.mubr.msk.f32.gmra.mxu0 %vm768_vm2, %v741_v23 }
 0x148   : > { %1605 = vmatmul.mubr.msk.f32.gmra.mxu1 %vm768_vm2, %v741_v23  ;;  %857 = vmatprep.mubr.f32.mxu0 %v2049_v18 }
 0x149   : > { %946 = vmatprep.mubr.f32.mxu1 %v2049_v18 }
 0x14b   : > { %1602 = vmatmul.mubr.msk.f32.gmra.mxu0 %vm768_vm2, %v742_v24 }
 0x14c   : > { %1606 = vmatmul.mubr.msk.f32.gmra.mxu1 %vm768_vm2, %v742_v24  ;;  %863 = vmatprep.mubr.f32.mxu0 %v2049_v18 }
 0x14d   : > { %952 = vmatprep.mubr.f32.mxu1 %v2049_v18 }
 0x14f   : > { %1603 = vmatmul.mubr.msk.f32.gmra.mxu0 %vm768_vm2, %v743_v25 }
 0x150   : > { %1607 = vmatmul.mubr.msk.f32.gmra.mxu1 %vm768_vm2, %v743_v25  ;;  %1145 = vmatprep.mubr.f32.mxu0 %v2049_v18 }
 0x151   : > { %1216 = vmatprep.mubr.f32.mxu1 %v2049_v18 }
 0x203   : > { %v847_v29 = vpop.f32.mrf.mxu0 }
 0x204   : > { %v848_v30 = vadd.f32 %v847_v29, %v751_v28  ;;  %v936_v31 = vpop.f32.mrf.mxu1 }
 0x205   : > { %v849_v32 = vpop.f32.mrf.mxu0  ;;  %v937_v62 = vadd.f32 %v936_v31, %v751_v28 }
 0x206   : > { %v1608_v33 = vmul.f32 -1.442695, %v848_v30  ;;  %v850_v34 = vadd.f32 %v849_v32, %v751_v28  ;;  %v938_v35 = vpop.f32.mrf.mxu1 }
 0x207   : > { %v939_v37 = vadd.f32 %v938_v35, %v751_v28  ;;  %v853_v38 = vpop.f32.mrf.mxu0  ;;  %v1610_v10 = vmul.f32 -1.442695, %v937_v62 }
 0x208   : > { %v1609_v39 = vmul.f32 -1.442695, %v850_v34  ;;  %v854_v40 = vadd.f32 %v853_v38, %v756_v36  ;;  %v942_v41 = vpop.f32.mrf.mxu1  ;;  %1874 = vpow2.f32 %v1608_v33 }
 0x209   : > { %v1611_v42 = vmul.f32 -1.442695, %v939_v37  ;;  %v943_v43 = vadd.f32 %v942_v41, %v756_v36  ;;  %v855_v18 = vpop.f32.mrf.mxu0 }
 0x20a   : > { %1876 = vpow2.f32 %v1609_v39  ;;  %v1612_v44 = vmul.f32 -1.442695, %v854_v40  ;;  %v856_v45 = vadd.f32 %v855_v18, %v756_v36  ;;  %v944_v46 = vpop.f32.mrf.mxu1 }
 0x20b   : > { %1878 = vpow2.f32 %v1611_v42  ;;  %v1614_v47 = vmul.f32 -1.442695, %v943_v43  ;;  %v945_v48 = vadd.f32 %v944_v46, %v756_v36  ;;  %v859_v49 = vpop.f32.mrf.mxu0 }
 0x20c   : > { %1880 = vpow2.f32 %v1612_v44  ;;  %v1613_v50 = vmul.f32 -1.442695, %v856_v45  ;;  %v860_v51 = vadd.f32 %v859_v49, %v761_v26  ;;  %v948_v52 = vpop.f32.mrf.mxu1 }
 0x20d   : > { %1882 = vpow2.f32 %v1614_v47  ;;  %v1615_v53 = vmul.f32 -1.442695, %v945_v48  ;;  %v949_v54 = vadd.f32 %v948_v52, %v761_v26  ;;  %v861_v55 = vpop.f32.mrf.mxu0 }
 0x20e   : > { %1884 = vpow2.f32 %v1613_v50  ;;  %v1616_v56 = vmul.f32 -1.442695, %v860_v51  ;;  %v862_v57 = vadd.f32 %v861_v55, %v761_v26  ;;  %v950_v58 = vpop.f32.mrf.mxu1 }
 0x20f   : > { %1886 = vpow2.f32 %v1615_v53  ;;  %v1618_v59 = vmul.f32 -1.442695, %v949_v54  ;;  %v951_v60 = vadd.f32 %v950_v58, %v761_v26  ;;  %v865_v61 = vpop.f32.mrf.mxu0 }
 0x210   : > { %1888 = vpow2.f32 %v1616_v56  ;;  %v1617_v63 = vmul.f32 -1.442695, %v862_v57  ;;  %v866_v0 = vadd.f32 %v865_v61, %v766_v27  ;;  %v954_v1 = vpop.f32.mrf.mxu1 }
 0x211   : > { %1890 = vpow2.f32 %v1618_v59  ;;  %v1619_v2 = vmul.f32 -1.442695, %v951_v60  ;;  %v955_v3 = vadd.f32 %v954_v1, %v766_v27  ;;  %v867_v4 = vpop.f32.mrf.mxu0 }
 0x212   : > { %1892 = vpow2.f32 %v1617_v63  ;;  %v1620_v5 = vmul.f32 -1.442695, %v866_v0  ;;  %v868_v6 = vadd.f32 %v867_v4, %v766_v27  ;;  %v956_v7 = vpop.f32.mrf.mxu1 }
 0x213   : > { %1894 = vpow2.f32 %v1619_v2  ;;  %v1622_v8 = vmul.f32 -1.442695, %v955_v3  ;;  %v957_v9 = vadd.f32 %v956_v7, %v766_v27 }
 0x214   : > { %1896 = vpow2.f32 %v1620_v5  ;;  %v1621_v11 = vmul.f32 -1.442695, %v868_v6 }
 0x215   : > { %1898 = vpow2.f32 %v1622_v8  ;;  %v1623_v12 = vmul.f32 -1.442695, %v957_v9  ;;  %v1875_v13 = vpop.eup %1874 }
 0x216   : > { %1900 = vpow2.f32 %v1621_v11  ;;  %v1007_v17 = vadd.f32 1.0, %v1875_v13 }
 0x217   : > { %v1877_v14 = vpop.eup %1876  ;;  %1902 = vpow2.f32 %v1623_v12  ;;  %v1071_v12 = vld [vmem:[%s2454_s22] sm:$0xf] }
 0x218   : > { %v1879_v15 = vpop.eup %1878  ;;  %1904 = vpow2.f32 %v1610_v10  ;;  %v1008_v20 = vadd.f32 1.0, %v1877_v14  ;;  %v1255_v14 = vld [vmem:[%s2213_s0 + $0xf8] sm:$0xff] }
 0x219   : > { %v1881_v16 = vpop.eup %1880  ;;  %1906 = vrcp.f32 %v1007_v17  ;;  %v1010_v18 = vadd.f32 1.0, %v1879_v15  ;;  %v1287_v15 = vld [vmem:[%s2213_s0 + $0x1f8] sm:$0xff] }
 0x21a   : > { %v1883_v19 = vpop.eup %1882  ;;  %v1011_v22 = vadd.f32 1.0, %v1881_v16  ;;  %1908 = vrcp.f32 %v1008_v20  ;;  %v1239_v16 = vld [vmem:[%s2213_s0 + $0x78] sm:$0xff]  ;;  %v1286_v20 = vld [vmem:[%s2213_s0 + $0x1f0] sm:$0xff] }
 0x21b   : > { %v1885_v21 = vpop.eup %1884  ;;  %v1013_v43 = vadd.f32 1.0, %v1883_v19  ;;  %v1271_v17 = vld [vmem:[%s2213_s0 + $0x178] sm:$0xff]  ;;  %v1254_v19 = vld [vmem:[%s2213_s0 + $0xf0] sm:$0xff] }
 0x21c   : > { %v1887_v23 = vpop.eup %1886  ;;  %v1012_v24 = vadd.f32 1.0, %v1885_v21  ;;  %1910 = vrcp.f32 %v1011_v22  ;;  %v1238_v21 = vld [vmem:[%s2213_s0 + $0x70] sm:$0xff] }
 0x21d   : > { %v1889_v25 = vpop.eup %1888  ;;  %v1014_v41 = vadd.f32 1.0, %v1887_v23  ;;  %v1270_v22 = vld [vmem:[%s2213_s0 + $0x170] sm:$0xff]  ;;  %v1253_v23 = vld [vmem:[%s2213_s0 + $0xe8] sm:$0xff] }
 0x21e   : > { %v1891_v26 = vpop.eup %1890  ;;  %v1015_v27 = vadd.f32 1.0, %v1889_v25  ;;  %1912 = vrcp.f32 %v1012_v24  ;;  %v1285_v24 = vld [vmem:[%s2213_s0 + $0x1e8] sm:$0xff] }
 0x21f   : > { %v1893_v28 = vpop.eup %1892  ;;  %v1017_v38 = vadd.f32 1.0, %v1891_v26  ;;  %v1237_v25 = vld [vmem:[%s2213_s0 + $0x68] sm:$0xff] }
 0x220   : > { %v1895_v29 = vpop.eup %1894  ;;  %v1016_v30 = vadd.f32 1.0, %v1893_v28  ;;  %1914 = vrcp.f32 %v1015_v27  ;;  %v1269_v26 = vld [vmem:[%s2213_s0 + $0x168] sm:$0xff]  ;;  %v1252_v27 = vld [vmem:[%s2213_s0 + $0xe0] sm:$0xff] }
 0x221   : > { %v1897_v31 = vpop.eup %1896  ;;  %v1018_v32 = vadd.f32 1.0, %v1895_v29  ;;  %v1284_v28 = vld [vmem:[%s2213_s0 + $0x1e0] sm:$0xff] }
 0x222   : > { %v1899_v33 = vpop.eup %1898  ;;  %1916 = vrcp.f32 %v1016_v30  ;;  %v1019_v34 = vadd.f32 1.0, %v1897_v31  ;;  %v1236_v29 = vld [vmem:[%s2213_s0 + $0x60] sm:$0xff]  ;;  %v1251_v31 = vld [vmem:[%s2213_s0 + $0xd8] sm:$0xff] }
 0x223   : > { %v1901_v35 = vpop.eup %1900  ;;  %1918 = vrcp.f32 %v1018_v32  ;;  %v1021_v36 = vadd.f32 1.0, %v1899_v33  ;;  %v1268_v30 = vld [vmem:[%s2213_s0 + $0x160] sm:$0xff]  ;;  %v1283_v32 = vld [vmem:[%s2213_s0 + $0x1d8] sm:$0xff] }
 0x224   : > { %v1903_v37 = vpop.eup %1902  ;;  %1920 = vrcp.f32 %v1019_v34  ;;  %v1020_v39 = vadd.f32 1.0, %v1901_v35  ;;  %v1235_v33 = vld [vmem:[%s2213_s0 + $0x58] sm:$0xff]  ;;  %v1250_v35 = vld [vmem:[%s2213_s0 + $0xd0] sm:$0xff] }
 0x225   : > { %v1905_v40 = vpop.eup %1904  ;;  %1922 = vrcp.f32 %v1021_v36  ;;  %v1022_v42 = vadd.f32 1.0, %v1903_v37  ;;  %v1267_v34 = vld [vmem:[%s2213_s0 + $0x158] sm:$0xff]  ;;  %v1282_v36 = vld [vmem:[%s2213_s0 + $0x1d0] sm:$0xff] }
 0x226   : > { %1924 = vrcp.f32 %v1020_v39  ;;  %v1009_v44 = vadd.f32 1.0, %v1905_v40  ;;  %v1907_v45 = vpop.eup %1906  ;;  %v1234_v37 = vld [vmem:[%s2213_s0 + $0x50] sm:$0xff]  ;;  %v1249_v39 = vld [vmem:[%s2213_s0 + $0xc8] sm:$0xff] }
 0x227   : > { %1926 = vrcp.f32 %v1022_v42  ;;  %v1909_v46 = vpop.eup %1908  ;;  %v1624_v11 = vadd.f32 -0.5, %v1907_v45  ;;  %v1281_v40 = vld [vmem:[%s2213_s0 + $0x1c8] sm:$0xff]  ;;  %v1264_v45 = vld [vmem:[%s2213_s0 + $0x140] sm:$0xff] }
 0x228   : > { %1928 = vrcp.f32 %v1017_v38  ;;  %v1625_v9 = vadd.f32 -0.5, %v1909_v46  ;;  %v1266_v38 = vld [vmem:[%s2213_s0 + $0x150] sm:$0xff]  ;;  %v1265_v42 = vld [vmem:[%s2213_s0 + $0x148] sm:$0xff]  ;;  %v1247_v46 = vld [vmem:[%s2213_s0 + $0xb8] sm:$0xff] }
 0x229   : > { %1930 = vrcp.f32 %v1014_v41  ;;  %v1911_v47 = vpop.eup %1910  ;;  %v1233_v41 = vld [vmem:[%s2213_s0 + $0x48] sm:$0xff] }
 0x22a   : > { %1932 = vrcp.f32 %v1013_v43  ;;  %v1628_v7 = vadd.f32 -0.5, %v1911_v47  ;;  %v1248_v43 = vld [vmem:[%s2213_s0 + $0xc0] sm:$0xff]  ;;  %v1279_v47 = vld [vmem:[%s2213_s0 + $0x1b8] sm:$0xff] }
 0x22b   : > { %1934 = vrcp.f32 %v1010_v18  ;;  %v1913_v48 = vpop.eup %1912  ;;  %v1280_v18 = vld [vmem:[%s2213_s0 + $0x1c0] sm:$0xff] }
 0x22c   : > { %1936 = vrcp.f32 %v1009_v44  ;;  %v1629_v4 = vadd.f32 -0.5, %v1913_v48  ;;  %v1232_v44 = vld [vmem:[%s2213_s0 + $0x40] sm:$0xff]  ;;  %v1231_v48 = vld [vmem:[%s2213_s0 + $0x38] sm:$0xff] }
 0x22d   : > { %v1915_v49 = vpop.eup %1914 }
 0x22e   : > { %v1632_v1 = vadd.f32 -0.5, %v1915_v49  ;;  %v1263_v49 = vld [vmem:[%s2213_s0 + $0x138] sm:$0xff] }
 0x22f   : > { %v1917_v50 = vpop.eup %1916 }
 0x230   : > { %v1919_v51 = vpop.eup %1918  ;;  %v1633_v62 = vadd.f32 -0.5, %v1917_v50  ;;  %v1246_v50 = vld [vmem:[%s2213_s0 + $0xb0] sm:$0xff] }
 0x231   : > { %v1921_v52 = vpop.eup %1920  ;;  %v1635_v0 = vadd.f32 -0.5, %v1919_v51  ;;  %v1278_v51 = vld [vmem:[%s2213_s0 + $0x1b0] sm:$0xff] }
 0x232   : > { %v1923_v53 = vpop.eup %1922  ;;  %v1636_v59 = vadd.f32 -0.5, %v1921_v52  ;;  %v1230_v52 = vld [vmem:[%s2213_s0 + $0x30] sm:$0xff] }
 0x233   : > { %v1925_v54 = vpop.eup %1924  ;;  %v1638_v61 = vadd.f32 -0.5, %v1923_v53  ;;  %v1262_v53 = vld [vmem:[%s2213_s0 + $0x130] sm:$0xff] }
 0x234   : > { %v1927_v55 = vpop.eup %1926  ;;  %v1637_v56 = vadd.f32 -0.5, %v1925_v54  ;;  %v1245_v54 = vld [vmem:[%s2213_s0 + $0xa8] sm:$0xff] }
 0x235   : > { %v1929_v57 = vpop.eup %1928  ;;  %v1639_v58 = vadd.f32 -0.5, %v1927_v55  ;;  %v1277_v55 = vld [vmem:[%s2213_s0 + $0x1a8] sm:$0xff] }
 0x236   : > { %v1931_v60 = vpop.eup %1930  ;;  %1105 = vmatprep.subr.mxu0 %v1637_v56  ;;  %v1634_v3 = vadd.f32 -0.5, %v1929_v57  ;;  %v1229_v56 = vld [vmem:[%s2213_s0 + $0x28] sm:$0xff] }
 0x237   : > { %v1933_v63 = vpop.eup %1932  ;;  %1176 = vmatprep.subr.mxu1 %v1639_v58  ;;  %1106 = vmatpush1.msra.mxu0 %v1636_v59  ;;  %v1631_v6 = vadd.f32 -0.5, %v1931_v60  ;;  %v1261_v57 = vld [vmem:[%s2213_s0 + $0x128] sm:$0xff]  ;;  %v1244_v58 = vld [vmem:[%s2213_s0 + $0xa0] sm:$0xff] }
 0x238   : > { %v1935_v2 = vpop.eup %1934  ;;  %1177 = vmatpush1.msra.mxu1 %v1638_v61  ;;  %1107 = vmatprep.subr.mxu0 %v1633_v62  ;;  %v1630_v8 = vadd.f32 -0.5, %v1933_v63  ;;  %v1276_v59 = vld [vmem:[%s2213_s0 + $0x1a0] sm:$0xff]  ;;  %v1243_v62 = vld [vmem:[%s2213_s0 + $0x98] sm:$0xff] }
 0x239   : > { %v1937_v5 = vpop.eup %1936  ;;  %1178 = vmatprep.subr.mxu1 %v1635_v0  ;;  %1108 = vmatpush1.msra.mxu0 %v1632_v1  ;;  %v1627_v10 = vadd.f32 -0.5, %v1935_v2  ;;  %v1228_v60 = vld [vmem:[%s2213_s0 + $0x20] sm:$0xff]  ;;  %v1275_v63 = vld [vmem:[%s2213_s0 + $0x198] sm:$0xff]  ;;  %v1242_v2 = vld [vmem:[%s2213_s0 + $0x90] sm:$0xff] }
 0x23a   : > { %1179 = vmatpush1.msra.mxu1 %v1634_v3  ;;  %1109 = vmatprep.subr.mxu0 %v1629_v4  ;;  %v1626_v13 = vadd.f32 -0.5, %v1937_v5  ;;  %v1260_v61 = vld [vmem:[%s2213_s0 + $0x120] sm:$0xff]  ;;  %v1227_v0 = vld [vmem:[%s2213_s0 + $0x18] sm:$0xff]  ;;  %v1274_v3 = vld [vmem:[%s2213_s0 + $0x190] sm:$0xff] }
 0x23b   : > { %1180 = vmatprep.subr.mxu1 %v1631_v6  ;;  %1110 = vmatpush1.msra.mxu0 %v1628_v7  ;;  %v1259_v1 = vld [vmem:[%s2213_s0 + $0x118] sm:$0xff]  ;;  %v1226_v4 = vld [vmem:[%s2213_s0 + $0x10] sm:$0xff]  ;;  %v1241_v6 = vld [vmem:[%s2213_s0 + $0x88] sm:$0xff] }
 0x23c   : > { %1181 = vmatpush1.msra.mxu1 %v1630_v8  ;;  %1111 = vmatprep.subr.mxu0 %v1625_v9  ;;  %v1258_v5 = vld [vmem:[%s2213_s0 + $0x110] sm:$0xff]  ;;  %v1273_v7 = vld [vmem:[%s2213_s0 + $0x188] sm:$0xff] }
 0x23d   : > { %1182 = vmatprep.subr.mxu1 %v1627_v10  ;;  %1112 = vmatpush1.msra.mxu0 %v1624_v11  ;;  %v1225_v8 = vld [vmem:[%s2213_s0 + $0x8] sm:$0xff]  ;;  %v1240_v10 = vld [vmem:[%s2213_s0 + $0x80] sm:$0xff] }
 0x23e   : > { %1183 = vmatpush1.msra.mxu1 %v1626_v13  ;;  %1640 = vmatmul.mubr.msk.f32.vlgmr.msra.gmra.mxu0 %vm768_vm2, %v1071_v12  ;;  %v1257_v9 = vld [vmem:[%s2213_s0 + $0x108] sm:$0xff]  ;;  %v1272_v11 = vld [vmem:[%s2213_s0 + $0x180] sm:$0xff] }
 0x23f   : > { %1641 = vmatmul.mubr.msk.f32.vlgmr.msra.gmra.mxu1 %vm768_vm2, %v1071_v12  ;;  %1648 = vmatprep.subr.mxu0 %v1255_v14  ;;  %v1224_v12 = vld [vmem:[%s2213_s0] sm:$0xff] }
 0x240   : > { %1683 = vmatprep.subr.mxu1 %v1287_v15  ;;  %1649 = vmatpush3.msra.mxu0 %v1239_v16  ;;  %v1256_v13 = vld [vmem:[%s2213_s0 + $0x100] sm:$0xff]  ;;  %v1076_v16 = vpop.permute.xlu0 %1075 }
 0x241   : > { %1684 = vmatpush3.msra.mxu1 %v1271_v17  ;;  %1650 = vmatprep.subr.mxu0 %v1254_v19 }
 0x242   : > { %1685 = vmatprep.subr.mxu1 %v1286_v20  ;;  %1651 = vmatpush3.msra.mxu0 %v1238_v21 }
 0x243   : > { %1686 = vmatpush3.msra.mxu1 %v1270_v22  ;;  %1652 = vmatprep.subr.mxu0 %v1253_v23 }
 0x244   : > { %1687 = vmatprep.subr.mxu1 %v1285_v24  ;;  %1653 = vmatpush3.msra.mxu0 %v1237_v25 }
 0x245   : > { %1688 = vmatpush3.msra.mxu1 %v1269_v26  ;;  %1654 = vmatprep.subr.mxu0 %v1252_v27 }
 0x246   : > { %1689 = vmatprep.subr.mxu1 %v1284_v28  ;;  %1655 = vmatpush3.msra.mxu0 %v1236_v29 }
 0x247   : > { %1690 = vmatpush3.msra.mxu1 %v1268_v30  ;;  %1656 = vmatprep.subr.mxu0 %v1251_v31  ;;  %v1223_v30 = vld [vmem:[#allocation2] sm:$0xf] }
 0x248   : > { %1691 = vmatprep.subr.mxu1 %v1283_v32  ;;  %1657 = vmatpush3.msra.mxu0 %v1235_v33 }
 0x249   : > { %1692 = vmatpush3.msra.mxu1 %v1267_v34  ;;  %1658 = vmatprep.subr.mxu0 %v1250_v35 }
 0x24a   : > { %1693 = vmatprep.subr.mxu1 %v1282_v36  ;;  %1659 = vmatpush3.msra.mxu0 %v1234_v37 }
 0x24b   : > { %1694 = vmatpush3.msra.mxu1 %v1266_v38  ;;  %1660 = vmatprep.subr.mxu0 %v1249_v39 }
 0x24c   : > { %1695 = vmatprep.subr.mxu1 %v1281_v40  ;;  %1661 = vmatpush3.msra.mxu0 %v1233_v41 }
 0x24d   : > { %1696 = vmatpush3.msra.mxu1 %v1265_v42  ;;  %1662 = vmatprep.subr.mxu0 %v1248_v43 }
 0x24e   : > { %1697 = vmatprep.subr.mxu1 %v1280_v18  ;;  %1663 = vmatpush3.msra.mxu0 %v1232_v44 }
 0x24f   : > { %1698 = vmatpush3.msra.mxu1 %v1264_v45  ;;  %1664 = vmatprep.subr.mxu0 %v1247_v46 }
 0x250   : > { %1699 = vmatprep.subr.mxu1 %v1279_v47  ;;  %1665 = vmatpush3.msra.mxu0 %v1231_v48 }
 0x251   : > { %1700 = vmatpush3.msra.mxu1 %v1263_v49  ;;  %1666 = vmatprep.subr.mxu0 %v1246_v50 }
 0x252   : > { %1701 = vmatprep.subr.mxu1 %v1278_v51  ;;  %1667 = vmatpush3.msra.mxu0 %v1230_v52 }
 0x253   : > { %1702 = vmatpush3.msra.mxu1 %v1262_v53  ;;  %1668 = vmatprep.subr.mxu0 %v1245_v54 }
 0x254   : > { %1703 = vmatprep.subr.mxu1 %v1277_v55  ;;  %1669 = vmatpush3.msra.mxu0 %v1229_v56 }
 0x255   : > { %1704 = vmatpush3.msra.mxu1 %v1261_v57  ;;  %1670 = vmatprep.subr.mxu0 %v1244_v58 }
 0x256   : > { %1705 = vmatprep.subr.mxu1 %v1276_v59  ;;  %1671 = vmatpush3.msra.mxu0 %v1228_v60 }
 0x257   : > { %1706 = vmatpush3.msra.mxu1 %v1260_v61  ;;  %1672 = vmatprep.subr.mxu0 %v1243_v62 }
 0x258   : > { %1707 = vmatprep.subr.mxu1 %v1275_v63  ;;  %1673 = vmatpush3.msra.mxu0 %v1227_v0 }
 0x259   : > { %1708 = vmatpush3.msra.mxu1 %v1259_v1  ;;  %1674 = vmatprep.subr.mxu0 %v1242_v2 }
 0x25a   : > { %1709 = vmatprep.subr.mxu1 %v1274_v3  ;;  %1675 = vmatpush3.msra.mxu0 %v1226_v4 }
 0x25b   : > { %1710 = vmatpush3.msra.mxu1 %v1258_v5  ;;  %1676 = vmatprep.subr.mxu0 %v1241_v6 }
 0x25c   : > { %1711 = vmatprep.subr.mxu1 %v1273_v7  ;;  %1677 = vmatpush3.msra.mxu0 %v1225_v8 }
 0x25d   : > { %1712 = vmatpush3.msra.mxu1 %v1257_v9  ;;  %1678 = vmatprep.subr.mxu0 %v1240_v10 }
 0x25e   : > { %1713 = vmatprep.subr.mxu1 %v1272_v11  ;;  %1679 = vmatpush3.msra.mxu0 %v1224_v12 }
 0x25f   : > { %1714 = vmatpush3.msra.mxu1 %v1256_v13 }
 0x2fe   : > { %v1147_v14 = vpop.f32.mrf.mxu0 }
 0x2ff   : > { %v1218_v15 = vpop.f32.mrf.mxu1  ;;  %v1148_v21 = vadd.f32 %v1147_v14, %v1076_v16 }
 0x300   : > { %v1149_v17 = vpop.f32.mrf.mxu0  ;;  %v1219_v23 = vadd.f32 %v1218_v15, %v1076_v16 }
 0x301   : > { %v1150_v19 = vadd.f32 %v1149_v17, %v1076_v16  ;;  %v1220_v20 = vpop.f32.mrf.mxu1 }
 0x302   : > { %v1221_v22 = vadd.f32 %v1220_v20, %v1076_v16 }
 0x303   : > { %1352 = vmatprep.mubr.f32.mxu0 %v1150_v19 }
 0x304   : > { %1422 = vmatprep.mubr.f32.mxu1 %v1221_v22  ;;  %1353 = vmatmul.mubr.f32.vlgmr.msra.gmra.mxu0 %v1148_v21 }
 0x305   : > { %1423 = vmatmul.mubr.f32.vlgmr.msra.gmra.mxu1 %v1219_v23 }
 0x3c4   : > { %v1680_v24 = vpop.f32.mrf.mxu0 }
 0x3c5   : > { %v1715_v25 = vpop.f32.mrf.mxu1 }
 0x3c6   : > { %v1681_v26 = vpop.f32.mrf.mxu0 }
 0x3c7   : > { %v1682_v27 = vadd.f32 %v1681_v26, %v1680_v24  ;;  %v1716_v28 = vpop.f32.mrf.mxu1 }
 0x3c8   : > { %v1717_v29 = vadd.f32 %v1716_v28, %v1715_v25 }
 0x3ca   : > { %v1425_v31 = vadd.f32 %v1717_v29, %v1682_v27  ;;  %1434 = sbr.rel (%p1642_p5) target bundleno = 983 (0x3d7), region = 83 }
 0x3cc   : > { %v1428_v32 = vadd.f32 %v1425_v31, %v1223_v30 }
 0x3ce   : > { %1430 = vst.msk [vmem:[#allocation2] sm:$0xf] %vm1429_vm3, %v1428_v32 }
 0x3d5   : > { %v1435_v33 = vld [vmem:[#allocation2] sm:$0xf] }
 0x3d6   : > { %1436 = vst.msk [vmem:[%s381_s17] sm:$0xf] %vm1429_vm3, %v1435_v33 }
 0x3d7 PF: > { %s1644_s0 = sshll.u32 %s2034_s11, 6  ;;  %s2455_s20 = sld [smem:[#allocation13_spill]] }
 0x3d8   : > { %s1451_s18 = sshll.u32 %s381_s17, 4  ;;  %s1438_s10 = scalar_lea.sflag [#allocation5], %s379_s23  ;;  %s1452_s18 = int_to_ptr.vmem [resolvable:$true] %s1451_s18 }
 0x3d9   : > { %s1938_s24 = scalar_lea.vmem %s1452_s18, 64  ;;  %s2051_s25 = smov [#allocation4]  }
 0x3da   : > { %p1939_p6 = scmp.ne.s32.totalorder %s1452_s18, %s1938_s24  ;;  %s1942_s16 = sshll.u32 %s2051_s25, 4  ;;  %s1943_s16 = int_to_ptr.vmem [resolvable:$false] %s1942_s16 }
 0x3db   : > { %s1944_s22 = scalar_lea.vmem %s1943_s16, 128  ;;  %p1945_p10 = scmp.lt.s32.totalorder %s1452_s18, %s1943_s16 }
 0x3dc   : > { %p1940_p7 = pnand %p1939_p6, %p2178_p9  ;;  %p1946_p11 = scmp.lt.s32.totalorder %s1944_s22, %s1938_s24 }
 0x3dd   : > { %s1449_s19 = scalar_lea.hbm %s2455_s20, %s1644_s0 }
 0x3de   : > { %p1941_p8 = pneg %p1940_p7  ;;  %p1947_p13 = por %p1946_p11, %p1945_p10 }
 0x3e0   : > { %p1948_p0 = pnand %p1947_p13, %p1941_p8 }
 0x3e2   : > { %1951 = shalt.err (!%p1948_p0)
}
 0x3e3   : > { %s1952_s11 = scalar_lea.hbm %s1449_s19, 64  ;;  %s1956_s15 = scalar_lea.hbm %s2455_s20, 128 }
 0x3e4   : > { %p1953_p1 = scmp.ne.s32.totalorder %s1449_s19, %s1952_s11  ;;  %p1957_p4 = scmp.lt.s32.totalorder %s1449_s19, %s2455_s20 }
 0x3e5   : > { %p1958_p5 = scmp.lt.s32.totalorder %s1956_s15, %s1952_s11 }
 0x3e6   : > { %p1954_p2 = pnand %p1953_p1, %p2178_p9 }
 0x3e7   : > { %p1959_p6 = por %p1958_p5, %p1957_p4 }
 0x3e8   : > { %p1955_p3 = pneg %p1954_p2 }
 0x3ea   : > { %p1960_p7 = pnand %p1959_p6, %p1955_p3 }
 0x3ec   : > { %1963 = shalt.err (!%p1960_p7)
}
 0x3ed   : > { %1718 = dma.vmem_to_hbm [thread:$0]  (%p2178_p9), %s1452_s18, 64, %s1449_s19, %s1438_s10  }
 0x3ee PF: > { %p1724_p8 = scmp.ge.s32.totalorder %s2046_s14, 2  ;;  %s1463_s30 = sand.u32 1, %s2010_s27  }
 0x3ef   : > { %s1464_s24 = scalar_lea.sflag [#allocation5], %s1463_s30 }
 0x3f0   : > { %p1721_p10 = pnand %p1724_p8, %p2188_p12 }
 0x3f2   : > { %p1722_p11 = pneg %p1721_p10 }
 0x3f4   : > { %2005 = dma.done.wait (%p1722_p11), %s1464_s24, 64  }
 0x3f5   : > { %2007 = vsyncadd (%p1722_p11), %s1464_s24, 4294967232  ;;  %s21_s14 = sadd.s32 1, %s2046_s14   ;;  %s2456_s10 = sld [smem:[#allocation7_spill]] }
 0x3f6   : > { %p18_p13 = scmp.ge.s32.totalorder %s21_s14, 6   ;;  %s2457_s12 = sld [smem:[#allocation8_spill]] }
 0x3f7   : > { %s2458_s19 = sld [smem:[#allocation9_spill]]  ;;  %s2459_s27 = smov %s2014_s28 }
 0x3f8   : > { %s2460_s28 = smov %s2018_s29  ;;  %s2461_s29 = smov %s2183_s8 }
 0x3f9   : > { %s2462_s30 = smov %s2026_s9  ;;  %s2463_s9 = smov %s2186_s5 }
 0x3fa   : > { %s2464_s11 = smov %s2042_s13  ;;  %20 = sbr.rel (!%p18_p13) target bundleno = 11 (0xb), region = 126 }
 0x3fd   : > { %s2465_s13 = smov %s2458_s19 }
 0x3ff   :  { %1469 = vsyncpa [#allocation5], 1 }
 0x400   :  { %1471 = vsyncpa [#allocation5 + $0x1], 1 }

</bundles_post_ra>
